<compile_context>
chip_gen: v7x
topology: tpu7x:2x2x1
jax: 0.10.0
libtpu: 0.0.40
codegen_flags: <defaults>
</compile_context>

<pallas_src>
import jax
import jax.numpy as jnp
from jax.experimental import pallas as pl
from jax.experimental.pallas import tpu as pltpu

H1, H2 = 400, 300          # logical hidden widths (PyTorch module)
H1P, H2P = 512, 384        # lane-aligned padded widths (multiples of 128)


def _round_up(x, m):
    return (x + m - 1) // m * m


def critic_kernel(x_ref, w1_ref, b1_ref, w2_ref, b2_ref, w3_ref, b3_ref, o_ref):
    # ---- fc1: single MXU matmul over the fused (state||action) input ----
    # x_ref is already bf16; bf16 operands, f32 accumulation.
    h1 = jnp.dot(x_ref[...], w1_ref[...],
                 preferred_element_type=jnp.float32) + b1_ref[...]   # (bm, H1P) f32
    h1 = jnp.maximum(h1, 0.0).astype(jnp.bfloat16)                   # write ReLU once, as bf16

    # ---- fc2 ----
    h2 = jnp.dot(h1, w2_ref[...],
                 preferred_element_type=jnp.float32) + b2_ref[...]   # (bm, H2P) f32
    h2 = jnp.maximum(h2, 0.0)

    # ---- out layer: N=1 -> VPU multiply + XLU lane reduce (skip the MXU) ----
    q = jnp.sum(h2 * w3_ref[...], axis=-1, keepdims=True) + b3_ref[0, 0]   # (bm, 1) f32
    # lane-dense store: (bm,1) column -> (1,bm) row (cheap XLU transpose)
    o_ref[0] = jnp.transpose(q)                                            # o_ref: (1, 1, bm)


def critic_forward(state, action, kernel_params, *, block_b=2048):
    """state: (B, state_dim) f32, action: (B, action_dim) f32 -> (B, 1) f32."""
    w1, b1, w2, b2, w3, b3 = kernel_params
    B = state.shape[0]
    K = w1.shape[0]                       # state_dim + action_dim

    # Fused fc1 input: concat in the wrapper (XLA fuses it) and pre-cast to bf16.
    x = jnp.concatenate([state, action], axis=1).astype(jnp.bfloat16)

    # Batch tile: multiple of 16 (bf16 sublane packing), capped by block_b.
    bm = min(block_b, _round_up(B, 16))
    # v7x megacore: guarantee >=2 grid steps for medium/large batches so the
    # "parallel" batch axis shards across both TensorCores (harmless on v5e/v6e).
    if B >= 256 and _round_up(B, bm) // bm < 2:
        bm = _round_up(-(-B // 2), 16)
    B_pad = _round_up(B, bm)
    if B_pad != B:
        x = jnp.pad(x, ((0, B_pad - B), (0, 0)))
    grid_b = B_pad // bm

    def resident(arr):  # weights: same block every grid step -> stay VMEM-resident
        return pl.BlockSpec(arr.shape, lambda i: (0,) * arr.ndim)

    flops = 2 * B_pad * (K * H1P + H1P * H2P + H2P)
    bytes_accessed = (B_pad * K * 2                 # bf16 input
                      + K * H1P * 2 + H1P * H2P * 2  # bf16 weights
                      + 4 * (H1P + H2P + H2P + 1)    # f32 biases + w3 row
                      + B_pad * 4)                   # f32 output

    out = pl.pallas_call(
        critic_kernel,
        out_shape=jax.ShapeDtypeStruct((grid_b, 1, bm), jnp.float32),
        grid=(grid_b,),
        in_specs=[
            pl.BlockSpec((bm, K), lambda i: (i, 0)),                 # fused input tile
            resident(w1), resident(b1),
            resident(w2), resident(b2),
            resident(w3),
            pl.BlockSpec(memory_space=pltpu.MemorySpace.SMEM),       # scalar b3
        ],
        out_specs=pl.BlockSpec((1, 1, bm), lambda i: (i, 0, 0)),     # lane-dense output
        compiler_params=pltpu.CompilerParams(
            dimension_semantics=("parallel",)),
        cost_estimate=pl.CostEstimate(flops=flops, transcendentals=0,
                                      bytes_accessed=bytes_accessed),
    )(x, w1, b1, w2, b2, w3, b3)

    return out.reshape(B_pad, 1)[:B]


def init_params(key, state_dim, action_dim):
    """Logical f32 params, mimicking PyTorch nn.Linear default init."""
    def linear(key, fan_in, fan_out):
        kw, kb = jax.random.split(key)
        bound = 1.0 / jnp.sqrt(fan_in)
        w = jax.random.uniform(kw, (fan_in, fan_out), jnp.float32, -bound, bound)
        b = jax.random.uniform(kb, (fan_out,), jnp.float32, -bound, bound)
        return w, b

    k1, k2, k3 = jax.random.split(key, 3)
    w1, b1 = linear(k1, state_dim + action_dim, H1)
    w2, b2 = linear(k2, H1, H2)
    w3, b3 = linear(k3, H2, 1)
    return (w1, b1, w2, b2, w3, b3)


def prepare_kernel_params(params):
    """Zero-pad hidden widths to lane multiples (math-preserving: padded weight
    rows/cols are 0 and ReLU(0)=0) and cast the big weight matrices to bf16."""
    w1, b1, w2, b2, w3, b3 = params
    w1p = jnp.pad(w1, ((0, 0), (0, H1P - H1))).astype(jnp.bfloat16)        # (K, H1P)
    b1p = jnp.pad(b1.reshape(1, H1), ((0, 0), (0, H1P - H1)))              # (1, H1P) f32
    w2p = jnp.pad(w2, ((0, H1P - H1), (0, H2P - H2))).astype(jnp.bfloat16) # (H1P, H2P)
    b2p = jnp.pad(b2.reshape(1, H2), ((0, 0), (0, H2P - H2)))              # (1, H2P) f32
    w3p = jnp.pad(w3.reshape(1, H2), ((0, 0), (0, H2P - H2)))              # (1, H2P) f32
    b3p = b3.reshape(1, 1)                                                 # SMEM scalar
    return (w1p, b1p, w2p, b2p, w3p, b3p)


if __name__ == "__main__":
    key = jax.random.PRNGKey(0)
    k_s, k_a, k_p = jax.random.split(key, 3)

    batch, state_dim, action_dim = 8, 24, 8
    state = jax.random.normal(k_s, (batch, state_dim), jnp.float32)
    action = jax.random.normal(k_a, (batch, action_dim), jnp.float32)

    params = init_params(k_p, state_dim, action_dim)
    kparams = prepare_kernel_params(params)

    q = critic_forward(state, action, kparams)
    q = jax.block_until_ready(q)
    assert q.shape == (batch, 1)

    # --- reference checks (same math as the PyTorch forward) ---
    w1, b1, w2, b2, w3, b3 = params
    x = jnp.concatenate([state, action], axis=1)

    # bf16-weight-matched reference (kernel uses bf16 operands, f32 accumulation)
    rd = lambda t: t.astype(jnp.bfloat16).astype(jnp.float32)
    h1m = jnp.maximum(rd(x) @ rd(w1) + b1, 0.0)
    h2m = jnp.maximum(rd(h1m) @ rd(w2) + b2, 0.0)
    q_match = h2m @ w3 + b3
    assert jnp.allclose(q, q_match, atol=1e-2, rtol=1e-2)

    # full-f32 reference (loose: bounds the bf16 weight-quantization error)
    h1 = jnp.maximum(x @ w1 + b1, 0.0)
    h2 = jnp.maximum(h1 @ w2 + b2, 0.0)
    q_ref = h2 @ w3 + b3
    assert jnp.allclose(q, q_ref, atol=1e-1, rtol=1e-1)

    print("KERNEL_OK")
</pallas_src>

<mosaic_0001>
module attributes {stable_mosaic.version = 11 : i64} {
  func.func @critic_kernel(%arg0: i32, %arg1: memref<16x32xbf16, #tpu.memory_space<vmem>>, %arg2: memref<32x512xbf16, #tpu.memory_space<vmem>>, %arg3: memref<1x512xf32, #tpu.memory_space<vmem>>, %arg4: memref<512x384xbf16, #tpu.memory_space<vmem>>, %arg5: memref<1x384xf32, #tpu.memory_space<vmem>>, %arg6: memref<1x384xf32, #tpu.memory_space<vmem>>, %arg7: memref<1x1xf32, #tpu.memory_space<smem>>, %arg8: memref<1x1x16xf32, #tpu.memory_space<vmem>>) attributes {dimension_semantics = [#tpu.dimension_semantics<parallel>], iteration_bounds = array<i64: 1>, scalar_prefetch = 0 : i64, scratch_operands = 0 : i64, tpu.core_type = #tpu.core_type<tc>, window_params = [{transform_indices = @transform_0, window_bounds = array<i64: 16, 32>}, {pipeline_mode = #tpu.pipeline_mode<synchronous>, transform_indices = @transform_1, window_bounds = array<i64: 32, 512>}, {pipeline_mode = #tpu.pipeline_mode<synchronous>, transform_indices = @transform_2, window_bounds = array<i64: 1, 512>}, {pipeline_mode = #tpu.pipeline_mode<synchronous>, transform_indices = @transform_3, window_bounds = array<i64: 512, 384>}, {pipeline_mode = #tpu.pipeline_mode<synchronous>, transform_indices = @transform_4, window_bounds = array<i64: 1, 384>}, {pipeline_mode = #tpu.pipeline_mode<synchronous>, transform_indices = @transform_5, window_bounds = array<i64: 1, 384>}, {transform_indices = @transform_6, window_bounds = array<i64: 1, 1>}, {transform_indices = @transform_7, window_bounds = array<i64: 1, 1, 16>}]} {
    %c0 = arith.constant 0 : index
    %c0_0 = arith.constant 0 : index
    %0 = vector.load %arg1[%c0, %c0_0] : memref<16x32xbf16, #tpu.memory_space<vmem>>, vector<16x32xbf16>
    %c0_1 = arith.constant 0 : index
    %c0_2 = arith.constant 0 : index
    %1 = vector.load %arg2[%c0_1, %c0_2] : memref<32x512xbf16, #tpu.memory_space<vmem>>, vector<32x512xbf16>
    %cst = arith.constant dense<0.000000e+00> : vector<16x512xf32>
    %2 = tpu.matmul %0, %1, %cst {dimension_numbers = #tpu.dot_dimension_numbers<[1], [0], [0], [1], [0, 0, 1, 1], [], []>} : vector<16x32xbf16>, vector<32x512xbf16>, vector<16x512xf32> -> vector<16x512xf32>
    %c0_3 = arith.constant 0 : index
    %c0_4 = arith.constant 0 : index
    %3 = vector.load %arg3[%c0_3, %c0_4] : memref<1x512xf32, #tpu.memory_space<vmem>>, vector<1x512xf32>
    %4 = vector.broadcast %3 : vector<1x512xf32> to vector<16x512xf32>
    %5 = arith.addf %2, %4 : vector<16x512xf32>
    %cst_5 = arith.constant 0.000000e+00 : f32
    %6 = vector.broadcast %cst_5 : f32 to vector<16x512xf32>
    %7 = arith.maximumf %5, %6 : vector<16x512xf32>
    %8 = arith.truncf %7 : vector<16x512xf32> to vector<16x512xbf16>
    %c0_6 = arith.constant 0 : index
    %c0_7 = arith.constant 0 : index
    %9 = vector.load %arg4[%c0_6, %c0_7] : memref<512x384xbf16, #tpu.memory_space<vmem>>, vector<512x384xbf16>
    %cst_8 = arith.constant dense<0.000000e+00> : vector<16x384xf32>
    %10 = tpu.matmul %8, %9, %cst_8 {dimension_numbers = #tpu.dot_dimension_numbers<[1], [0], [0], [1], [0, 0, 1, 1], [], []>} : vector<16x512xbf16>, vector<512x384xbf16>, vector<16x384xf32> -> vector<16x384xf32>
    %c0_9 = arith.constant 0 : index
    %c0_10 = arith.constant 0 : index
    %11 = vector.load %arg5[%c0_9, %c0_10] : memref<1x384xf32, #tpu.memory_space<vmem>>, vector<1x384xf32>
    %12 = vector.broadcast %11 : vector<1x384xf32> to vector<16x384xf32>
    %13 = arith.addf %10, %12 : vector<16x384xf32>
    %cst_11 = arith.constant 0.000000e+00 : f32
    %14 = vector.broadcast %cst_11 : f32 to vector<16x384xf32>
    %15 = arith.maximumf %13, %14 : vector<16x384xf32>
    %c0_12 = arith.constant 0 : index
    %c0_13 = arith.constant 0 : index
    %16 = vector.load %arg6[%c0_12, %c0_13] : memref<1x384xf32, #tpu.memory_space<vmem>>, vector<1x384xf32>
    %17 = vector.broadcast %16 : vector<1x384xf32> to vector<16x384xf32>
    %18 = arith.mulf %15, %17 : vector<16x384xf32>
    %cst_14 = arith.constant dense<0.000000e+00> : vector<16xf32>
    %19 = vector.multi_reduction <add>, %18, %cst_14 [1] : vector<16x384xf32> to vector<16xf32>
    %20 = vector.shape_cast %19 : vector<16xf32> to vector<16x1xf32>
    %c0_15 = arith.constant 0 : index
    %c0_16 = arith.constant 0 : index
    %21 = memref.load %arg7[%c0_15, %c0_16] : memref<1x1xf32, #tpu.memory_space<smem>>
    %22 = vector.broadcast %21 : f32 to vector<16x1xf32>
    %23 = arith.addf %20, %22 : vector<16x1xf32>
    %24 = tpu.transpose %23, [1, 0] : vector<16x1xf32> -> vector<1x16xf32>
    %c0_17 = arith.constant 0 : index
    %c0_18 = arith.constant 0 : index
    %c0_19 = arith.constant 0 : index
    %25 = vector.load %arg8[%c0_17, %c0_18, %c0_19] : memref<1x1x16xf32, #tpu.memory_space<vmem>>, vector<1x1x16xf32>
    %26 = vector.shape_cast %25 : vector<1x1x16xf32> to vector<1x16xf32>
    %27 = vector.shape_cast %24 : vector<1x16xf32> to vector<1x1x16xf32>
    tpu.vector_store %arg8[%c0_17, %c0_18, %c0_19], %27 {strides = array<i32>} : memref<1x1x16xf32, #tpu.memory_space<vmem>>, vector<1x1x16xf32>,
    return
  }
  func.func @transform_0(%arg0: i32) -> (i32, i32) {
    %c0_i32 = arith.constant 0 : i32
    %c0_i32_0 = arith.constant 0 : i32
    return %arg0, %c0_i32 : i32, i32
  }
  func.func @transform_1(%arg0: i32) -> (i32, i32) {
    %c0_i32 = arith.constant 0 : i32
    %c0_i32_0 = arith.constant 0 : i32
    %c0_i32_1 = arith.constant 0 : i32
    return %c0_i32, %c0_i32_0 : i32, i32
  }
  func.func @transform_2(%arg0: i32) -> (i32, i32) {
    %c0_i32 = arith.constant 0 : i32
    %c0_i32_0 = arith.constant 0 : i32
    %c0_i32_1 = arith.constant 0 : i32
    return %c0_i32, %c0_i32_0 : i32, i32
  }
  func.func @transform_3(%arg0: i32) -> (i32, i32) {
    %c0_i32 = arith.constant 0 : i32
    %c0_i32_0 = arith.constant 0 : i32
    %c0_i32_1 = arith.constant 0 : i32
    return %c0_i32, %c0_i32_0 : i32, i32
  }
  func.func @transform_4(%arg0: i32) -> (i32, i32) {
    %c0_i32 = arith.constant 0 : i32
    %c0_i32_0 = arith.constant 0 : i32
    %c0_i32_1 = arith.constant 0 : i32
    return %c0_i32, %c0_i32_0 : i32, i32
  }
  func.func @transform_5(%arg0: i32) -> (i32, i32) {
    %c0_i32 = arith.constant 0 : i32
    %c0_i32_0 = arith.constant 0 : i32
    %c0_i32_1 = arith.constant 0 : i32
    return %c0_i32, %c0_i32_0 : i32, i32
  }
  func.func @transform_6(%arg0: i32) -> (i32, i32) {
    %c0_i32 = arith.constant 0 : i32
    %c0_i32_0 = arith.constant 0 : i32
    %c0_i32_1 = arith.constant 0 : i32
    return %c0_i32, %c0_i32_0 : i32, i32
  }
  func.func @transform_7(%arg0: i32) -> (i32, i32, i32) {
    %c0_i32 = arith.constant 0 : i32
    %c0_i32_0 = arith.constant 0 : i32
    %c0_i32_1 = arith.constant 0 : i32
    return %arg0, %c0_i32, %c0_i32_0 : i32, i32, i32
  }
}

</mosaic_0001>

<bundles_post_ra>
// kernel: tpu_custom_call.1
= control target key start
LH: loop header
LB: loop body
LE: loop exit
PB: predicated region body
PF: predicated region fallthrough
CT: control target
= control target key end

     0   :  { %13 = vsyncpa [#allocation4], 0  ;;  %s1703_s0 = inlined_call_operand.hbm [shape: bf16[16,32], index: 0, kind: input, shape index: {}]   ;;  %s1704_s1 = inlined_call_operand.hbm [shape: bf16[32,512], index: 1, kind: input, shape index: {}]   ;;  %s1705_s2 = inlined_call_operand.vmem [shape: f32[1,512], index: 2, kind: input, shape index: {}]   ;;  %s1706_s3 = inlined_call_operand.hbm [shape: bf16[512,384], index: 3, kind: input, shape index: {}]   ;;  %s1707_s4 = inlined_call_operand.vmem [shape: f32[1,384], index: 4, kind: input, shape index: {}]   ;;  %s1708_s5 = inlined_call_operand.vmem [shape: f32[1,384], index: 5, kind: input, shape index: {}]   ;;  %s1709_s6 = inlined_call_operand.<no memory space> [shape: f32[1,1], index: 6, kind: input, shape index: {}]   ;;  %s1710_s7 = inlined_call_operand.hbm [shape: f32[1,1,16], index: 7, kind: output, shape index: {}]  }
   0x1   :  { %14 = vsyncpa [#allocation7], 0 }
   0x2   :  { %15 = vsyncpa [#allocation5], 0  ;;  %s1571_s24 = smov [#allocation6]   ;;  %s1477_s28 = scalar_lea.hbm %s1704_s1, 1024 }
   0x3   :  { %s33_s25 = sshll.u32 %s1571_s24, 4  ;;  %p1478_p0 = scmp.ne.s32.totalorder %s1704_s1, %s1477_s28  ;;  %s34_s25 = int_to_ptr.vmem [resolvable:$true] %s33_s25 }
   0x4   :  { %p1481_p1 = scmp.lt.u32.totalorder %s1477_s28, %s1704_s1 }
   0x6   :  { %p1483_p2 = pnand %p1481_p1, %p1478_p0 }
   0x8   :  { %1486 = shalt.err (!%p1483_p2)
}
   0x9   :  { %s1487_s10 = scalar_lea.vmem %s34_s25, 1024  ;;  %p1492_p4 = scmp.lt.s32.totalorder %s34_s25, %s34_s25 }
   0xa   :  { %p1488_p3 = scmp.ne.s32.totalorder %s34_s25, %s1487_s10  ;;  %p1493_p5 = scmp.lt.s32.totalorder %s1487_s10, %s1487_s10 }
   0xc   :  { %p1494_p6 = por %p1493_p5, %p1492_p4 }
   0xe   :  { %p1495_p7 = pnand %p1494_p6, %p1488_p3 }
  0x10   :  { %1498 = shalt.err (!%p1495_p7)
}
  0x11   :  { %s1572_s11 = smov 256   ;;  %s1573_s12 = smov 16  }
  0x12   :  { %39 = dma.hbm_to_vmem [thread:$0]  %s1704_s1, 1024, %s34_s25, [#allocation7], %s1572_s11, %s1572_s11, %s1573_s12  }
  0x13   :  { %s1574_s15 = smov [#allocation3]   ;;  %s1499_s19 = scalar_lea.hbm %s1703_s0, 128 }
  0x14   :  { %s21_s16 = sshll.u32 %s1574_s15, 4  ;;  %p1500_p8 = scmp.ne.s32.totalorder %s1703_s0, %s1499_s19  ;;  %s22_s16 = int_to_ptr.vmem [resolvable:$true] %s21_s16 }
  0x15   :  { %p1503_p9 = scmp.lt.u32.totalorder %s1499_s19, %s1703_s0 }
  0x17   :  { %p1505_p10 = pnand %p1503_p9, %p1500_p8 }
  0x19   :  { %1508 = shalt.err (!%p1505_p10)
}
  0x1a   :  { %s1509_s24 = scalar_lea.vmem %s22_s16, 128  ;;  %p1514_p12 = scmp.lt.s32.totalorder %s22_s16, %s22_s16 }
  0x1b   :  { %p1510_p11 = scmp.ne.s32.totalorder %s22_s16, %s1509_s24  ;;  %p1515_p13 = scmp.lt.s32.totalorder %s1509_s24, %s1509_s24 }
  0x1d   :  { %p1516_p0 = por %p1515_p13, %p1514_p12 }
  0x1f   :  { %p1517_p1 = pnand %p1516_p0, %p1510_p11 }
  0x21   :  { %1520 = shalt.err (!%p1517_p1)
}
  0x22   :  { %s1575_s1 = smov 64   ;;  %s1576_s25 = smov 4  }
  0x23   :  { %27 = dma.hbm_to_vmem [thread:$0]  %s1703_s0, 128, %s22_s16, [#allocation4], %s1575_s1, %s1575_s1, %s1576_s25  }
  0x24   :  { %s1577_s28 = smov [#allocation8]   ;;  %s1521_s9 = scalar_lea.hbm %s1706_s3, 12288 }
  0x25   :  { %s47_s29 = sshll.u32 %s1577_s28, 4  ;;  %p1522_p2 = scmp.ne.s32.totalorder %s1706_s3, %s1521_s9  ;;  %s48_s29 = int_to_ptr.vmem [resolvable:$true] %s47_s29 }
  0x26   :  { %p1525_p3 = scmp.lt.u32.totalorder %s1521_s9, %s1706_s3 }
  0x28   :  { %p1527_p4 = pnand %p1525_p3, %p1522_p2 }
  0x2a   :  { %1530 = shalt.err (!%p1527_p4)
}
  0x2b   :  { %s1531_s14 = scalar_lea.vmem %s48_s29, 12288  ;;  %p1536_p6 = scmp.lt.s32.totalorder %s48_s29, %s48_s29 }
  0x2c   :  { %p1532_p5 = scmp.ne.s32.totalorder %s48_s29, %s1531_s14  ;;  %p1537_p7 = scmp.lt.s32.totalorder %s1531_s14, %s1531_s14 }
  0x2e   :  { %p1538_p8 = por %p1537_p7, %p1536_p6 }
  0x30   :  { %p1539_p9 = pnand %p1538_p8, %p1532_p5 }
  0x32   :  { %1542 = shalt.err (!%p1539_p9)
}
  0x33   :  { %s1578_s0 = smov 192   ;;  %s1579_s15 = smov 12  }
  0x34   :  { %53 = dma.hbm_to_vmem [thread:$0]  %s1706_s3, 12288, %s48_s29, [#allocation7], %s1578_s0, %s1578_s0, %s1579_s15  }
  0x35   :  { %1565 = dma.done.wait [#allocation4], 128  }
  0x36   :  { %1566 = vsyncadd [#allocation4], 4294967168 }
  0x37   :  { %1567 = dma.done.wait [#allocation7], 13312  }
  0x38   :  { %1568 = vsyncadd [#allocation7], 4294953984  ;;  %v1580_v0 = vmov 0   ;;  %v1336_v1 = vld [vmem:[#allocation6 + $0x4] ss:$16 sps:$4 sm:$0xff]   ;;  %v1342_v6 = vld [vmem:[#allocation3] sm:$0xff]   ;;  %v82_v60 = vlaneseq }
  0x39   :  { %183 = vmatprep.mubr.bf16.mxu1 %v1580_v0  ;;  %v1338_v2 = vld [vmem:[#allocation6] ss:$16 sps:$4 sm:$0xff]   ;;  %151 = vmatprep.subr.bf16.mxu1 %v1336_v1  ;;  %v1339_v3 = vld [vmem:[#allocation6 + $0x24] ss:$16 sps:$4 sm:$0xff]   ;;  %v1345_v5 = vld [vmem:[#allocation6 + $0xc] ss:$16 sps:$4 sm:$0xff]  }
  0x3a   :  { %152 = vmatpush1.bf16.msra.mxu1 %v1338_v2  ;;  %v1341_v4 = vld [vmem:[#allocation6 + $0x20] ss:$16 sps:$4 sm:$0xff]   ;;  %v1343_v7 = vld [vmem:[#allocation6 + $0x8] ss:$16 sps:$4 sm:$0xff]   ;;  %vm147_vm0 = vcmask 261120   ;;  %v83_v61 = vshrl.u32 %v82_v60, 7 }
  0x3b   :  { %153 = vmatprep.subr.bf16.mxu1 %v1339_v3  ;;  %v1349_v8 = vld [vmem:[#allocation8 + $0x4] ss:$12 sps:$4 sm:$0xff]   ;;  %v1351_v9 = vld [vmem:[#allocation8] ss:$12 sps:$4 sm:$0xff]   ;;  %v1352_v11 = vld [vmem:[#allocation8 + $0x1c] ss:$12 sps:$4 sm:$0xff]  }
  0x3c   :  { %v1348_v10 = vld [vmem:[#allocation6 + $0x2c] ss:$16 sps:$4 sm:$0xff]   ;;  %906 = vmatprep.subr.bf16.mxu0 %v1349_v8  ;;  %v1354_v12 = vld [vmem:[#allocation8 + $0x18] ss:$12 sps:$4 sm:$0xff]   ;;  %v1355_v14 = vld [vmem:[#allocation8 + $0x34] ss:$12 sps:$4 sm:$0xff]  }
  0x3d   :  { %907 = vmatpush1.bf16.msra.mxu0 %v1351_v9  ;;  %v1346_v13 = vld [vmem:[#allocation6 + $0x28] ss:$16 sps:$4 sm:$0xff]   ;;  %v1357_v15 = vld [vmem:[#allocation8 + $0x30] ss:$12 sps:$4 sm:$0xff]   ;;  %v1363_v21 = vld [vmem:[#allocation8 + $0x60] ss:$12 sps:$4 sm:$0xff]  }
  0x3e   :  { %154 = vmatpush1.bf16.msra.mxu1 %v1341_v4  ;;  %908 = vmatprep.subr.bf16.mxu0 %v1352_v11  ;;  %v1358_v16 = vld [vmem:[#allocation8 + $0x4c] ss:$12 sps:$4 sm:$0xff]   ;;  %v1360_v17 = vld [vmem:[#allocation8 + $0x48] ss:$12 sps:$4 sm:$0xff]   ;;  %v1361_v19 = vld [vmem:[#allocation8 + $0x64] ss:$12 sps:$4 sm:$0xff]  }
  0x3f   :  { %194 = vmatprep.subr.bf16.mxu1 %v1345_v5  ;;  %v1375_v18 = vld [vmem:[#allocation8 + $0xc8] ss:$12 sps:$4 sm:$0xff]   ;;  %v1380_v23 = vld [vmem:[#allocation8 + $0xe0] ss:$12 sps:$4 sm:$0xff]   ;;  %v1366_v25 = vld [vmem:[#allocation8 + $0x78] ss:$12 sps:$4 sm:$0xff]  }
  0x40   :  { %v1377_v20 = vld [vmem:[#allocation8 + $0x8] ss:$12 sps:$4 sm:$0xff]   ;;  %v1382_v24 = vld [vmem:[#allocation8 + $0x20] ss:$12 sps:$4 sm:$0xff]   ;;  %v1385_v26 = vld [vmem:[#allocation8 + $0xf8] ss:$12 sps:$4 sm:$0xff]  }
  0x41   :  { %1174 = vmatmul.mubr.msk.bf16.vlgmr.msra.gmra.mrb[0].mxu1 %vm147_vm0, %v1342_v6  ;;  %909 = vmatpush1.bf16.msra.mxu0 %v1354_v12  ;;  %v1364_v22 = vld [vmem:[#allocation8 + $0x7c] ss:$12 sps:$4 sm:$0xff]   ;;  %v1387_v27 = vld [vmem:[#allocation8 + $0x38] ss:$12 sps:$4 sm:$0xff]   ;;  %v1367_v28 = vld [vmem:[#allocation8 + $0x94] ss:$12 sps:$4 sm:$0xff]  }
  0x42   :  { %195 = vmatpush1.bf16.msra.mxu1 %v1343_v7  ;;  %226 = vmatprep.mubr.bf16.mxu1 %v1580_v0  ;;  %v1390_v29 = vld [vmem:[#allocation8 + $0x110] ss:$12 sps:$4 sm:$0xff]   ;;  %v1370_v32 = vld [vmem:[#allocation8 + $0xac] ss:$12 sps:$4 sm:$0xff]   ;;  %v1395_v33 = vld [vmem:[#allocation8 + $0x128] ss:$12 sps:$4 sm:$0xff]  }
  0x43   :  { %196 = vmatprep.subr.bf16.mxu1 %v1348_v10  ;;  %910 = vmatprep.subr.bf16.mxu0 %v1355_v14  ;;  %v1369_v30 = vld [vmem:[#allocation8 + $0x90] ss:$12 sps:$4 sm:$0xff]   ;;  %v1372_v34 = vld [vmem:[#allocation8 + $0xa8] ss:$12 sps:$4 sm:$0xff]   ;;  %v1400_v37 = vld [vmem:[#allocation8 + $0x140] ss:$12 sps:$4 sm:$0xff]  }
  0x44   :  { %v1392_v31 = vld [vmem:[#allocation8 + $0x50] ss:$12 sps:$4 sm:$0xff]   ;;  %v1397_v35 = vld [vmem:[#allocation8 + $0x68] ss:$12 sps:$4 sm:$0xff]   ;;  %v1376_v38 = vld [vmem:[#allocation8 + $0xc0] ss:$12 sps:$4 sm:$0xff]  }
  0x45   :  { %911 = vmatpush1.bf16.msra.mxu0 %v1357_v15  ;;  %v1373_v36 = vld [vmem:[#allocation8 + $0xc4] ss:$12 sps:$4 sm:$0xff]   ;;  %v1378_v39 = vld [vmem:[#allocation8 + $0xdc] ss:$12 sps:$4 sm:$0xff]   ;;  %v1402_v40 = vld [vmem:[#allocation8 + $0x80] ss:$12 sps:$4 sm:$0xff]  }
  0x46   :  { %197 = vmatpush1.bf16.msra.mxu1 %v1346_v13  ;;  %912 = vmatprep.subr.bf16.mxu0 %v1358_v16  ;;  %v1381_v41 = vld [vmem:[#allocation8 + $0xd8] ss:$12 sps:$4 sm:$0xff]   ;;  %v1383_v42 = vld [vmem:[#allocation8 + $0xf4] ss:$12 sps:$4 sm:$0xff]   ;;  %v1386_v43 = vld [vmem:[#allocation8 + $0xf0] ss:$12 sps:$4 sm:$0xff]  }
  0x47   :  { %1272 = vmatprep.subr.bf16.mxu1 %v1375_v18  ;;  %v1388_v44 = vld [vmem:[#allocation8 + $0x10c] ss:$12 sps:$4 sm:$0xff]   ;;  %v1391_v45 = vld [vmem:[#allocation8 + $0x108] ss:$12 sps:$4 sm:$0xff]   ;;  %v1393_v46 = vld [vmem:[#allocation8 + $0x124] ss:$12 sps:$4 sm:$0xff]  }
  0x48   :  { %v1396_v47 = vld [vmem:[#allocation8 + $0x120] ss:$12 sps:$4 sm:$0xff]   ;;  %v1398_v48 = vld [vmem:[#allocation8 + $0x13c] ss:$12 sps:$4 sm:$0xff]   ;;  %v1401_v49 = vld [vmem:[#allocation8 + $0x138] ss:$12 sps:$4 sm:$0xff]  }
  0x49   :  { %1175 = vmatmul.mubr.msk.bf16.vlgmr.msra.gmra.mrb[4].mxu1 %vm147_vm0, %v1342_v6  ;;  %913 = vmatpush1.bf16.msra.mxu0 %v1360_v17  ;;  %v1403_v50 = vld [vmem:[#allocation8 + $0x154] ss:$12 sps:$4 sm:$0xff]   ;;  %v1405_v51 = vld [vmem:[#allocation8 + $0x158] ss:$12 sps:$4 sm:$0xff]   ;;  %v1406_v52 = vld [vmem:[#allocation8 + $0x150] ss:$12 sps:$4 sm:$0xff]  }
  0x4a   :  { %1273 = vmatpush3.bf16.msra.mxu1 %v1377_v20  ;;  %914 = vmatprep.subr.bf16.mxu0 %v1361_v19  ;;  %v1407_v53 = vld [vmem:[#allocation8 + $0x98] ss:$12 sps:$4 sm:$0xff]   ;;  %v1410_v55 = vld [vmem:[#allocation8 + $0x170] ss:$12 sps:$4 sm:$0xff]   ;;  %v1411_v56 = vld [vmem:[#allocation8 + $0x168] ss:$12 sps:$4 sm:$0xff]  }
  0x4b   :  { %1274 = vmatprep.subr.bf16.mxu1 %v1380_v23  ;;  %v1408_v54 = vld [vmem:[#allocation8 + $0x16c] ss:$12 sps:$4 sm:$0xff]   ;;  %v1412_v57 = vld [vmem:[#allocation8 + $0xb0] ss:$12 sps:$4 sm:$0xff]   ;;  %v1416_v59 = vld [vmem:[#allocation8 + $0x248] ss:$12 sps:$4 sm:$0xff]  }
  0x4c   :  { %v1415_v58 = vld [vmem:[#allocation8 + $0x184] ss:$12 sps:$4 sm:$0xff]   ;;  %v1660_v62 = vsub.s32 0, %v83_v61  ;;  %v80_v63 = vld [vmem:[%s1705_s2] sm:$0xf]  ;;  %v1665_v0 = vsub.s32 1, %v83_v61 }
  0x4d   :  { %915 = vmatpush1.bf16.msra.mxu0 %v1363_v21  ;;  %v1669_v6 = vsub.s32 2, %v83_v61  ;;  %v96_v9 = vsub.s32 3, %v83_v61  ;;  %v1413_v21 = vld [vmem:[#allocation8 + $0x180] ss:$12 sps:$4 sm:$0xff]   ;;  %v1447_v60 = vld [vmem:[#allocation8 + $0x218] ss:$12 sps:$4 sm:$0xff]  }
  0x4e   :  { %1275 = vmatpush3.bf16.msra.mxu1 %v1382_v24  ;;  %916 = vmatprep.subr.bf16.mxu0 %v1364_v22  ;;  %v85_v1 = vrot.slane %v80_v63, %v1660_v62  ;;  %v89_v2 = vrot.slane %v80_v63, %v1665_v0  ;;  %v1417_v22 = vld [vmem:[#allocation8 + $0x188] ss:$12 sps:$4 sm:$0xff]   ;;  %v1450_v61 = vld [vmem:[#allocation8 + $0x22c] ss:$12 sps:$4 sm:$0xff]   ;;  %s1581_s22 = smov [#allocation9]   ;;  %vm1147_vm1 = vcmask 122880  }
  0x4f   :  { %1276 = vmatprep.subr.bf16.mxu1 %v1385_v26  ;;  %v93_v15 = vrot.slane %v80_v63, %v1669_v6  ;;  %v97_v18 = vrot.slane %v80_v63, %v96_v9  ;;  %v1420_v24 = vld [vmem:[#allocation8 + $0x19c] ss:$12 sps:$4 sm:$0xff]   ;;  %s1155_s23 = sshll.u32 %s1581_s22, 4  ;;  %s1156_s23 = int_to_ptr.vmem [resolvable:$true] %s1155_s23 }
  0x50   :  { %v1451_v63 = vld [vmem:[#allocation8 + $0x2f0] ss:$12 sps:$4 sm:$0xff]   ;;  %s1543_s24 = scalar_lea.vmem %s1156_s23, 16  ;;  %s1547_s1 = scalar_lea.vmem %s1156_s23, 32 }
  0x51   :  { %917 = vmatpush1.bf16.msra.mxu0 %v1366_v25  ;;  %v1421_v25 = vld [vmem:[#allocation8 + $0x260] ss:$12 sps:$4 sm:$0xff]   ;;  %v1459_v9 = vld [vmem:[#allocation8 + $0x270] ss:$12 sps:$4 sm:$0xff]   ;;  %p1544_p10 = scmp.ne.s32.totalorder %s1156_s23, %s1543_s24  ;;  %p1548_p11 = scmp.lt.s32.totalorder %s1156_s23, %s1156_s23 }
  0x52   :  { %1277 = vmatpush3.bf16.msra.mxu1 %v1387_v27  ;;  %918 = vmatprep.subr.bf16.mxu0 %v1367_v28  ;;  %p1549_p12 = scmp.lt.s32.totalorder %s1547_s1, %s1543_s24 }
  0x53   :  { %1278 = vmatprep.subr.bf16.mxu1 %v1390_v29 }
  0x54   :  { %p1550_p13 = por %p1549_p12, %p1548_p11 }
  0x55   :  { %919 = vmatpush1.bf16.msra.mxu0 %v1369_v30 }
  0x56   :  { %1279 = vmatpush3.bf16.msra.mxu1 %v1392_v31  ;;  %920 = vmatprep.subr.bf16.mxu0 %v1370_v32  ;;  %p1551_p0 = pnand %p1550_p13, %p1544_p10 }
  0x57   :  { %1280 = vmatprep.subr.bf16.mxu1 %v1395_v33  ;;  %v1418_v33 = vld [vmem:[#allocation8 + $0x198] ss:$12 sps:$4 sm:$0xff]  }
  0x59   :  { %921 = vmatpush1.bf16.msra.mxu0 %v1372_v34  ;;  %v1422_v34 = vld [vmem:[#allocation8 + $0x1a0] ss:$12 sps:$4 sm:$0xff]  }
  0x5a   :  { %1281 = vmatpush3.bf16.msra.mxu1 %v1397_v35  ;;  %922 = vmatprep.subr.bf16.mxu0 %v1373_v36 }
  0x5b   :  { %1282 = vmatprep.subr.bf16.mxu1 %v1400_v37  ;;  %v1425_v37 = vld [vmem:[#allocation8 + $0x1b4] ss:$12 sps:$4 sm:$0xff]  }
  0x5d   :  { %923 = vmatpush1.bf16.msra.mxu0 %v1376_v38  ;;  %v1426_v38 = vld [vmem:[#allocation8 + $0x278] ss:$12 sps:$4 sm:$0xff]  }
  0x5e   :  { %1283 = vmatpush3.bf16.msra.mxu1 %v1402_v40  ;;  %924 = vmatprep.subr.bf16.mxu0 %v1378_v39 }
  0x5f   :  { %1284 = vmatprep.subr.bf16.mxu1 %v1405_v51  ;;  %v1433_v51 = vld [vmem:[#allocation8 + $0x1e0] ss:$12 sps:$4 sm:$0xff]  }
  0x61   :  { %925 = vmatpush1.bf16.msra.mxu0 %v1381_v41 }
  0x62   :  { %926 = vmatprep.subr.bf16.mxu0 %v1383_v42  ;;  %1285 = vmatpush3.bf16.msra.mxu1 %v1407_v53  ;;  %v1423_v42 = vld [vmem:[#allocation8 + $0x1b0] ss:$12 sps:$4 sm:$0xff]  }
  0x63   :  { %1286 = vmatprep.subr.bf16.mxu1 %v1410_v55  ;;  %v1440_v53 = vld [vmem:[#allocation8 + $0x1fc] ss:$12 sps:$4 sm:$0xff]   ;;  %v1438_v55 = vld [vmem:[#allocation8 + $0x1f8] ss:$12 sps:$4 sm:$0xff]  }
  0x65   :  { %927 = vmatpush1.bf16.msra.mxu0 %v1386_v43  ;;  %v1427_v43 = vld [vmem:[#allocation8 + $0x1b8] ss:$12 sps:$4 sm:$0xff]  }
  0x66   :  { %928 = vmatprep.subr.bf16.mxu0 %v1388_v44  ;;  %1287 = vmatpush3.bf16.msra.mxu1 %v1412_v57  ;;  %v1445_v57 = vld [vmem:[#allocation8 + $0x214] ss:$12 sps:$4 sm:$0xff]  }
  0x67   :  { %1294 = vmatprep.subr.bf16.mxu1 %v1416_v59  ;;  %v1443_v59 = vld [vmem:[#allocation8 + $0x210] ss:$12 sps:$4 sm:$0xff]  }
  0x69   :  { %929 = vmatpush1.bf16.msra.mxu0 %v1391_v45  ;;  %v1430_v45 = vld [vmem:[#allocation8 + $0x1cc] ss:$12 sps:$4 sm:$0xff]  }
  0x6a   :  { %930 = vmatprep.subr.bf16.mxu0 %v1393_v46  ;;  %v1431_v46 = vld [vmem:[#allocation8 + $0x290] ss:$12 sps:$4 sm:$0xff]  }
  0x6d   :  { %931 = vmatpush1.bf16.msra.mxu0 %v1396_v47  ;;  %v1428_v47 = vld [vmem:[#allocation8 + $0x1c8] ss:$12 sps:$4 sm:$0xff]  }
  0x6e   :  { %932 = vmatprep.subr.bf16.mxu0 %v1398_v48  ;;  %v1432_v48 = vld [vmem:[#allocation8 + $0x1d0] ss:$12 sps:$4 sm:$0xff]  }
  0x71   :  { %933 = vmatpush1.bf16.msra.mxu0 %v1401_v49  ;;  %v1435_v49 = vld [vmem:[#allocation8 + $0x1e4] ss:$12 sps:$4 sm:$0xff]  }
  0x72   :  { %934 = vmatprep.subr.bf16.mxu0 %v1403_v50  ;;  %v1436_v50 = vld [vmem:[#allocation8 + $0x2a8] ss:$12 sps:$4 sm:$0xff]  }
  0x75   :  { %935 = vmatpush1.bf16.msra.mxu0 %v1406_v52  ;;  %v1437_v52 = vld [vmem:[#allocation8 + $0x1e8] ss:$12 sps:$4 sm:$0xff]  }
  0x76   :  { %936 = vmatprep.subr.bf16.mxu0 %v1408_v54  ;;  %v1441_v54 = vld [vmem:[#allocation8 + $0x2c0] ss:$12 sps:$4 sm:$0xff]  }
  0x79   :  { %937 = vmatpush1.bf16.msra.mxu0 %v1411_v56  ;;  %v1442_v56 = vld [vmem:[#allocation8 + $0x200] ss:$12 sps:$4 sm:$0xff]  }
  0x7a   :  { %949 = vmatprep.subr.bf16.mxu0 %v1415_v58  ;;  %v1446_v58 = vld [vmem:[#allocation8 + $0x2d8] ss:$12 sps:$4 sm:$0xff]  }
 0x114   :  { %v185_v3 = vpop.f32.mrb[0].mxu1 }
 0x115   :  { %v186_v4 = vadd.f32 %v185_v3, %v85_v1  ;;  %v187_v5 = vpop.f32.mrb[1].mxu1  ;;  %v1455_v3 = vld [vmem:[#allocation8 + $0x244] ss:$12 sps:$4 sm:$0xff]  }
 0x116   :  { %v188_v7 = vadd.f32 %v187_v5, %v89_v2  ;;  %v189_v8 = vpop.f32.mrb[2].mxu1  ;;  %v1458_v5 = vld [vmem:[#allocation8 + $0x25c] ss:$12 sps:$4 sm:$0xff]  }
 0x117   :  { %v190_v10 = vadd.f32 %v189_v8, %v85_v1  ;;  %v191_v11 = vpop.f32.mrb[3].mxu1  ;;  %v237_v13 = vmax.f32 %v186_v4, 0.0  ;;  %v1448_v1 = vld [vmem:[#allocation8 + $0x228] ss:$12 sps:$4 sm:$0xff]   ;;  %v1453_v4 = vld [vmem:[#allocation8 + $0x240] ss:$12 sps:$4 sm:$0xff]  }
 0x118   :  { %v192_v12 = vadd.f32 %v191_v11, %v89_v2  ;;  %v238_v16 = vmax.f32 %v188_v7, 0.0  ;;  %v1452_v2 = vld [vmem:[#allocation8 + $0x230] ss:$12 sps:$4 sm:$0xff]   ;;  %v1456_v7 = vld [vmem:[#allocation8 + $0x258] ss:$12 sps:$4 sm:$0xff]  }
 0x119   :  { %v241_v14 = vmax.f32 %v190_v10, 0.0  ;;  %v1461_v8 = vld [vmem:[#allocation8 + $0x274] ss:$12 sps:$4 sm:$0xff]   ;;  %v1464_v10 = vld [vmem:[#allocation8 + $0x28c] ss:$12 sps:$4 sm:$0xff]  }
 0x11a   :  { %v242_v17 = vmax.f32 %v192_v12, 0.0  ;;  %v1462_v11 = vld [vmem:[#allocation8 + $0x288] ss:$12 sps:$4 sm:$0xff]   ;;  %v1467_v12 = vld [vmem:[#allocation8 + $0x2a4] ss:$12 sps:$4 sm:$0xff]  }
 0x11b   :  { %v245_v19 = vpack.c.bf16 %v241_v14, %v237_v13  ;;  %v1465_v13 = vld [vmem:[#allocation8 + $0x2a0] ss:$12 sps:$4 sm:$0xff]   ;;  %v1470_v14 = vld [vmem:[#allocation8 + $0x2bc] ss:$12 sps:$4 sm:$0xff]  }
 0x11c   :  { %v246_v20 = vpack.c.bf16 %v242_v17, %v238_v16  ;;  %v228_v23 = vpop.f32.mrb[4].mxu1  ;;  %v1473_v16 = vld [vmem:[#allocation8 + $0x2d4] ss:$12 sps:$4 sm:$0xff]   ;;  %v1471_v17 = vld [vmem:[#allocation8 + $0x2d0] ss:$12 sps:$4 sm:$0xff]  }
 0x11d   :  { %v229_v26 = vadd.f32 %v228_v23, %v93_v15  ;;  %v230_v27 = vpop.f32.mrb[5].mxu1 }
 0x11e   :  { %938 = vmatprep.mubr.bf16.mxu0 %v246_v20  ;;  %1024 = vmatprep.mubr.bf16.mxu1 %v246_v20  ;;  %v231_v28 = vadd.f32 %v230_v27, %v97_v18  ;;  %v232_v29 = vpop.f32.mrb[6].mxu1 }
 0x11f   :  { %939 = vmatmul.mubr.bf16.vlgmr.msra.gmra.mrb[0].mxu0 %v245_v19  ;;  %1025 = vmatmul.mubr.bf16.vlgmr.msra.gmra.mrb[8].mxu1 %v245_v19  ;;  %v239_v30 = vmax.f32 %v229_v26, 0.0  ;;  %v233_v31 = vadd.f32 %v232_v29, %v93_v15  ;;  %v234_v32 = vpop.f32.mrb[7].mxu1  ;;  %v1468_v15 = vld [vmem:[#allocation8 + $0x2b8] ss:$12 sps:$4 sm:$0xff]   ;;  %v1474_v19 = vld [vmem:[#allocation8 + $0x2e8] ss:$12 sps:$4 sm:$0xff]  }
 0x120   :  { %950 = vmatpush1.bf16.msra.mxu0 %v1413_v21  ;;  %1295 = vmatpush3.bf16.msra.mxu1 %v1417_v22  ;;  %v240_v35 = vmax.f32 %v231_v28, 0.0  ;;  %v235_v36 = vadd.f32 %v234_v32, %v97_v18  ;;  %v1476_v18 = vld [vmem:[#allocation8 + $0x2ec] ss:$12 sps:$4 sm:$0xff]  }
 0x121   :  { %951 = vmatprep.subr.bf16.mxu0 %v1420_v24  ;;  %1296 = vmatprep.subr.bf16.mxu1 %v1421_v25  ;;  %v243_v39 = vmax.f32 %v233_v31, 0.0  ;;  %v377_v26 = vld [vmem:[%s1707_s4] sm:$0x7] }
 0x122   :  { %v244_v40 = vmax.f32 %v235_v36, 0.0  ;;  %v390_v27 = vrot.slane %v377_v26, %v1669_v6 }
 0x123   :  { %v1672_v41 = vpack.c.bf16 %v243_v39, %v239_v30  ;;  %v386_v39 = vrot.slane %v377_v26, %v1665_v0 }
 0x124   :  { %952 = vmatpush1.bf16.msra.mxu0 %v1418_v33  ;;  %1297 = vmatpush3.bf16.msra.mxu1 %v1422_v34  ;;  %v248_v44 = vpack.c.bf16 %v244_v40, %v240_v35 }
 0x125   :  { %953 = vmatprep.subr.bf16.mxu0 %v1425_v37  ;;  %1298 = vmatprep.subr.bf16.mxu1 %v1426_v38  ;;  %v382_v38 = vrot.slane %v377_v26, %v1660_v62 }
 0x126   :  { %1065 = vmatprep.mubr.bf16.mxu1 %v248_v44  ;;  %981 = vmatprep.mubr.bf16.mxu0 %v248_v44 }
 0x128   :  { %954 = vmatpush1.bf16.msra.mxu0 %v1423_v42  ;;  %1299 = vmatpush3.bf16.msra.mxu1 %v1427_v43 }
 0x129   :  { %955 = vmatprep.subr.bf16.mxu0 %v1430_v45  ;;  %1300 = vmatprep.subr.bf16.mxu1 %v1431_v46 }
 0x12c   :  { %956 = vmatpush1.bf16.msra.mxu0 %v1428_v47  ;;  %1301 = vmatpush3.bf16.msra.mxu1 %v1432_v48 }
 0x12d   :  { %957 = vmatprep.subr.bf16.mxu0 %v1435_v49  ;;  %1302 = vmatprep.subr.bf16.mxu1 %v1436_v50 }
 0x130   :  { %958 = vmatpush1.bf16.msra.mxu0 %v1433_v51  ;;  %1303 = vmatpush3.bf16.msra.mxu1 %v1437_v52 }
 0x131   :  { %959 = vmatprep.subr.bf16.mxu0 %v1440_v53  ;;  %1304 = vmatprep.subr.bf16.mxu1 %v1441_v54 }
 0x134   :  { %960 = vmatpush1.bf16.msra.mxu0 %v1438_v55  ;;  %1305 = vmatpush3.bf16.msra.mxu1 %v1442_v56 }
 0x135   :  { %961 = vmatprep.subr.bf16.mxu0 %v1445_v57  ;;  %1306 = vmatprep.subr.bf16.mxu1 %v1446_v58 }
 0x138   :  { %962 = vmatpush1.bf16.msra.mxu0 %v1443_v59  ;;  %1307 = vmatpush3.bf16.msra.mxu1 %v1447_v60 }
 0x139   :  { %963 = vmatprep.subr.bf16.mxu0 %v1450_v61  ;;  %1308 = vmatprep.subr.bf16.mxu1 %v1451_v63 }
 0x13c   :  { %964 = vmatpush1.bf16.msra.mxu0 %v1448_v1  ;;  %1309 = vmatpush3.bf16.msra.mxu1 %v1452_v2 }
 0x13d   :  { %965 = vmatprep.subr.bf16.mxu0 %v1455_v3 }
 0x13f   :  { %1066 = vmatmul.mubr.bf16.vlgmr.msra.gmra.mrb[12].mxu1 %v1672_v41 }
 0x140   :  { %966 = vmatpush1.bf16.msra.mxu0 %v1453_v4  ;;  %v1112_v4 = vstv %s1709_s6 }
 0x141   :  { %967 = vmatprep.subr.bf16.mxu0 %v1458_v5 }
 0x144   :  { %968 = vmatpush1.bf16.msra.mxu0 %v1456_v7 }
 0x145   :  { %969 = vmatprep.subr.bf16.mxu0 %v1461_v8 }
 0x148   :  { %970 = vmatpush1.bf16.msra.mxu0 %v1459_v9 }
 0x149   :  { %971 = vmatprep.subr.bf16.mxu0 %v1464_v10 }
 0x14c   :  { %972 = vmatpush1.bf16.msra.mxu0 %v1462_v11 }
 0x14d   :  { %973 = vmatprep.subr.bf16.mxu0 %v1467_v12 }
 0x150   :  { %974 = vmatpush1.bf16.msra.mxu0 %v1465_v13 }
 0x151   :  { %975 = vmatprep.subr.bf16.mxu0 %v1470_v14 }
 0x154   :  { %976 = vmatpush1.bf16.msra.mxu0 %v1468_v15 }
 0x155   :  { %977 = vmatprep.subr.bf16.mxu0 %v1473_v16 }
 0x158   :  { %978 = vmatpush1.bf16.msra.mxu0 %v1471_v17 }
 0x159   :  { %979 = vmatprep.subr.bf16.mxu0 %v1476_v18 }
 0x15c   :  { %980 = vmatpush1.bf16.msra.mxu0 %v1474_v19 }
 0x15f   :  { %982 = vmatmul.mubr.bf16.vlgmr.msra.gmra.mrb[0].mxu0 %v1672_v41  ;;  %v1080_v41 = vld [vmem:[%s1708_s5] sm:$0x7] }
 0x160   :  { %v1085_v43 = vrot.slane %v1080_v41, %v1660_v62  ;;  %v1089_v46 = vrot.slane %v1080_v41, %v1665_v0  ;;  %v1093_v54 = vrot.slane %v1080_v41, %v1669_v6 }
 0x1f2   :  { %v1288_v20 = vpop.f32.mrb[8].mxu1 }
 0x1f3   :  { %v1289_v21 = vpop.f32.mrb[9].mxu1 }
 0x1f4   :  { %v1290_v22 = vadd.f32 %v1289_v21, %v1288_v20  ;;  %v1291_v23 = vpop.f32.mrb[10].mxu1 }
 0x1f5   :  { %v1292_v24 = vpop.f32.mrb[11].mxu1 }
 0x1f6   :  { %v1293_v25 = vadd.f32 %v1292_v24, %v1291_v23  ;;  %v1027_v30 = vadd.f32 %v1290_v22, %v390_v27 }
 0x1f8   :  { %v1030_v34 = vadd.f32 %v1293_v25, %v390_v27 }
 0x212   :  { %v1310_v28 = vpop.f32.mrb[12].mxu1 }
 0x213   :  { %v1311_v29 = vpop.f32.mrb[13].mxu1 }
 0x214   :  { %v1312_v31 = vadd.f32 %v1311_v29, %v1310_v28  ;;  %v1313_v32 = vpop.f32.mrb[14].mxu1 }
 0x215   :  { %v1314_v33 = vpop.f32.mrb[15].mxu1 }
 0x216   :  { %v1068_v35 = vadd.f32 %v1312_v31, %v1027_v30  ;;  %v1315_v36 = vadd.f32 %v1314_v33, %v1313_v32 }
 0x218   :  { %v1071_v37 = vadd.f32 %v1315_v36, %v1030_v34  ;;  %v1076_v51 = vmax.f32 %v1068_v35, 0.0 }
 0x21a   :  { %v1079_v57 = vmax.f32 %v1071_v37, 0.0  ;;  %v1099_v61 = vmul.f32 %v1093_v54, %v1076_v51 }
 0x21c   :  { %v1102_v0 = vmul.f32 %v1093_v54, %v1079_v57 }
 0x232   :  { %v983_v40 = vpop.f32.mrb[0].mxu0 }
 0x233   :  { %v1316_v42 = vadd.f32 %v983_v40, %v382_v38  ;;  %v985_v44 = vpop.f32.mrb[1].mxu0 }
 0x234   :  { %v1317_v45 = vadd.f32 %v985_v44, %v386_v39  ;;  %v987_v47 = vpop.f32.mrb[2].mxu0 }
 0x235   :  { %v1074_v48 = vmax.f32 %v1316_v42, 0.0  ;;  %v1318_v49 = vadd.f32 %v987_v47, %v382_v38  ;;  %v989_v50 = vpop.f32.mrb[3].mxu0 }
 0x236   :  { %v1075_v52 = vmax.f32 %v1317_v45, 0.0  ;;  %v1319_v53 = vadd.f32 %v989_v50, %v386_v39 }
 0x237   :  { %v1097_v55 = vmul.f32 %v1085_v43, %v1074_v48  ;;  %v1077_v56 = vmax.f32 %v1318_v49, 0.0 }
 0x238   :  { %v1098_v58 = vmul.f32 %v1089_v46, %v1075_v52  ;;  %v1078_v59 = vmax.f32 %v1319_v53, 0.0 }
 0x239   :  { %v1100_v60 = vmul.f32 %v1085_v43, %v1077_v56 }
 0x23a   :  { %v1101_v62 = vmul.f32 %v1089_v46, %v1078_v59  ;;  %v1103_v63 = vadd.f32 %v1098_v58, %v1097_v55 }
 0x23c   :  { %v1104_v1 = vadd.f32 %v1103_v63, %v1099_v61  ;;  %v1107_v2 = vadd.f32 %v1101_v62, %v1100_v60 }
 0x23e   :  { %1105 = vadd.xlane.f32.xlu0 %v1104_v1  ;;  %v1108_v3 = vadd.f32 %v1107_v2, %v1102_v0 }
 0x242   :  { %1109 = vadd.xlane.f32.xlu0 %v1108_v3 }
 0x2cb   :  { %v1106_v6 = vpop.xlane.xlu0 %1105 }
 0x2cc   :  { %v1113_v5 = vadd.f32 %v1112_v4, %v1106_v6 }
 0x2ce   :  { %1115 = vxpose.xlu1.b32.start [1/2] (short) (narrow) %v1113_v5, 8 }
 0x2cf   :  { %v1110_v7 = vpop.xlane.xlu0 %1109 }
 0x2d0   :  { %v1114_v8 = vadd.f32 %v1112_v4, %v1110_v7 }
 0x2d2   :  { %1116 = vxpose.xlu1.b32.end [2/2] (short) (narrow) %v1114_v8, 8 }
 0x34e   :  { %v1131_v9 = vpop.trf.xlu1 }
 0x34f   :  { %1148 = vst.msk [vmem:[#allocation9] sm:$0x1] %vm1147_vm1, %v1131_v9 }
 0x350   :  { %1554 = shalt.err (!%p1551_p0)
}
 0x351   :  { %s1555_s26 = scalar_lea.hbm %s1710_s7, 16 }
 0x352   :  { %p1556_p1 = scmp.ne.s32.totalorder %s1710_s7, %s1555_s26  ;;  %p1559_p2 = scmp.lt.u32.totalorder %s1555_s26, %s1710_s7 }
 0x354   :  { %p1561_p3 = pnand %p1559_p2, %p1556_p1 }
 0x356   :  { %1564 = shalt.err (!%p1561_p3)
}
 0x357   :  { %1158 = dma.vmem_to_hbm [thread:$0]  %s1156_s23, 16, %s1710_s7, [#allocation5]  }
 0x358   :  { %1569 = dma.done.wait [#allocation5], 16  }
 0x359   :  { %1570 = vsyncadd [#allocation5], 4294967280 }
 0x35a   :  { %1162 = vsyncpa [#allocation4], 1 }
 0x35b   :  { %1163 = vsyncpa [#allocation7], 1 }
 0x35c   :  { %1164 = vsyncpa [#allocation5], 1 }

</bundles_post_ra>
